<compile_context>
chip_gen: v7x
topology: tpu7x:2x2x1
jax: 0.10.0
libtpu: 0.0.40
codegen_flags: <defaults>
</compile_context>

<pallas_src>
import jax
import jax.numpy as jnp
from jax.experimental import pallas as pl
from jax.experimental.pallas import tpu as pltpu


def lstm_fc_kernel(x_ref, wih_ref, whh_ref, b_ref, wfc_ref, bfc_ref,
                   out_ref, gx_scr):
    """One invocation handles one batch block for the FULL sequence:
    hoisted input projection -> unrolled recurrence -> fused FC head."""
    BB, S, D = x_ref.shape
    H = whh_ref.shape[0]

    # ---- Hoisted input projection (outside the serial chain). -------------
    # gx_scr[t, b, :] = x[b, t, :] @ W_ih^T + (b_ih + b_hh)
    # One (S, D) x (D, 4H) MXU matmul per sequence in the block (M dim = S
    # instead of the old per-step M = B); these are independent of the
    # recurrence and of each other, so they pipeline freely.
    for b in range(BB):
        proj = jnp.dot(x_ref[b], wih_ref[...],
                       preferred_element_type=jnp.float32) + b_ref[...]
        gx_scr[:, b, :] = proj                       # time-major scratch

    # ---- Serial recurrence: only h @ W_hh^T + gate math per step. ---------
    h = jnp.zeros((BB, H), jnp.float32)
    c = jnp.zeros((BB, H), jnp.float32)
    # S is a small static trip count -> fully unrolled at trace time.
    # TODO(synk): for long sequences switch to a time-chunked structure
    # (lax.fori_loop / inner pipeline) to bound unrolled code size.
    for t in range(S):
        gates = gx_scr[t] + jnp.dot(h.astype(whh_ref.dtype), whh_ref[...],
                                    preferred_element_type=jnp.float32)
        i_g = jax.nn.sigmoid(gates[:, 0 * H:1 * H])
        f_g = jax.nn.sigmoid(gates[:, 1 * H:2 * H])
        g_g = jnp.tanh(gates[:, 2 * H:3 * H])
        o_g = jax.nn.sigmoid(gates[:, 3 * H:4 * H])
        c = f_g * c + i_g * g_g
        h = o_g * jnp.tanh(c)

    # ---- Fused classifier head on the final hidden state. -----------------
    out_ref[...] = (jnp.dot(h.astype(wfc_ref.dtype), wfc_ref[...],
                            preferred_element_type=jnp.float32)
                    + bfc_ref[...]).astype(out_ref.dtype)


def lstm_model_forward(x, params, *, batch_block=None,
                       compute_dtype=jnp.float32):
    """x: (batch, seq, input_dim) float32 (batch_first, like PyTorch).
    Returns (batch, num_classes) float32.

    batch_block: optional batch tile; blocks are independent and the grid axis
    is marked "parallel" (v7x megacore).  Default = whole batch in one block.
    compute_dtype: jnp.bfloat16 recommended on v6e/v7x once H scales; matmul
    accumulation and the h/c state stay float32."""
    w_ih, w_hh, b_ih, b_hh, w_fc, b_fc = (
        params["w_ih"], params["w_hh"], params["b_ih"], params["b_hh"],
        params["w_fc"], params["b_fc"])
    B, S, D = x.shape
    H = w_hh.shape[1]
    C = w_fc.shape[0]

    # Pre-transpose weights once so the kernel does plain `x @ W` MXU matmuls.
    wih_t = w_ih.T.astype(compute_dtype)             # (D, 4H)
    whh_t = w_hh.T.astype(compute_dtype)             # (H, 4H)
    wfc_t = w_fc.T.astype(compute_dtype)             # (H, C)
    bias = (b_ih + b_hh).reshape(1, 4 * H).astype(jnp.float32)
    bfc = b_fc.reshape(1, C).astype(jnp.float32)
    x_c = x.astype(compute_dtype)                    # (B, S, D), no transpose

    # Batch blocking (the only grid axis).
    if batch_block is None or batch_block >= B:
        bb = B
    else:
        bb = max(8, -(-batch_block // 8) * 8)        # sublane-align sub-blocks
    b_pad = -(-B // bb) * bb
    if b_pad != B:
        x_c = jnp.pad(x_c, ((0, b_pad - B), (0, 0), (0, 0)))

    out = pl.pallas_call(
        lstm_fc_kernel,
        out_shape=jax.ShapeDtypeStruct((b_pad, C), jnp.float32),
        grid_spec=pltpu.PrefetchScalarGridSpec(
            num_scalar_prefetch=0,
            grid=(b_pad // bb,),
            in_specs=[
                pl.BlockSpec((bb, S, D), lambda i: (i, 0, 0)),    # x block
                pl.BlockSpec((D, 4 * H), lambda i: (0, 0)),       # W_ih^T
                pl.BlockSpec((H, 4 * H), lambda i: (0, 0)),       # W_hh^T
                pl.BlockSpec((1, 4 * H), lambda i: (0, 0)),       # b_ih + b_hh
                pl.BlockSpec((H, C), lambda i: (0, 0)),           # W_fc^T
                pl.BlockSpec((1, C), lambda i: (0, 0)),           # b_fc
            ],
            out_specs=pl.BlockSpec((bb, C), lambda i: (i, 0)),
            scratch_shapes=[
                pltpu.VMEM((S, bb, 4 * H), jnp.float32),          # gates_x
            ],
        ),
        compiler_params=pltpu.CompilerParams(
            dimension_semantics=("parallel",)),
    )(x_c, wih_t, whh_t, bias, wfc_t, bfc)
    return out[:B]


def lstm_model_reference(x, params):
    """Pure-JAX reference replicating torch.nn.LSTM (1 layer) + nn.Linear."""
    w_ih, w_hh, b_ih, b_hh, w_fc, b_fc = (
        params["w_ih"], params["w_hh"], params["b_ih"], params["b_hh"],
        params["w_fc"], params["b_fc"])
    B, S, D = x.shape
    H = w_hh.shape[1]
    h = jnp.zeros((B, H), jnp.float32)
    c = jnp.zeros((B, H), jnp.float32)
    for t in range(S):
        gates = x[:, t, :] @ w_ih.T + h @ w_hh.T + b_ih + b_hh
        i = jax.nn.sigmoid(gates[:, 0 * H:1 * H])
        f = jax.nn.sigmoid(gates[:, 1 * H:2 * H])
        g = jnp.tanh(gates[:, 2 * H:3 * H])
        o = jax.nn.sigmoid(gates[:, 3 * H:4 * H])
        c = f * c + i * g
        h = o * jnp.tanh(c)
    return h @ w_fc.T + b_fc


def init_params(key, input_dim, hidden_dim, num_classes):
    ks = jax.random.split(key, 6)
    scale = 1.0 / jnp.sqrt(hidden_dim)
    return {
        "w_ih": jax.random.uniform(ks[0], (4 * hidden_dim, input_dim),
                                   jnp.float32, -scale, scale),
        "w_hh": jax.random.uniform(ks[1], (4 * hidden_dim, hidden_dim),
                                   jnp.float32, -scale, scale),
        "b_ih": jax.random.uniform(ks[2], (4 * hidden_dim,),
                                   jnp.float32, -scale, scale),
        "b_hh": jax.random.uniform(ks[3], (4 * hidden_dim,),
                                   jnp.float32, -scale, scale),
        "w_fc": jax.random.uniform(ks[4], (num_classes, hidden_dim),
                                   jnp.float32, -scale, scale),
        "b_fc": jax.random.uniform(ks[5], (num_classes,),
                                   jnp.float32, -scale, scale),
    }


if __name__ == "__main__":
    batch, seq, input_dim, hidden_dim, num_classes = 2, 8, 16, 32, 4
    key = jax.random.PRNGKey(0)
    kx, kp = jax.random.split(key)
    x = jax.random.normal(kx, (batch, seq, input_dim), jnp.float32)
    params = init_params(kp, input_dim, hidden_dim, num_classes)

    out = lstm_model_forward(x, params)
    out = jax.block_until_ready(out)

    ref = lstm_model_reference(x, params)
    assert out.shape == (batch, num_classes)
    assert jnp.allclose(out, ref, atol=2e-5, rtol=2e-5), (
        f"mismatch: {jnp.max(jnp.abs(out - ref))}")
    print("KERNEL_OK")
</pallas_src>

<mosaic_0001>
module attributes {stable_mosaic.version = 11 : i64} {
  func.func @lstm_fc_kernel(%arg0: i32, %arg1: memref<2x8x16xf32, #tpu.memory_space<vmem>>, %arg2: memref<16x128xf32, #tpu.memory_space<vmem>>, %arg3: memref<32x128xf32, #tpu.memory_space<vmem>>, %arg4: memref<1x128xf32, #tpu.memory_space<vmem>>, %arg5: memref<32x4xf32, #tpu.memory_space<vmem>>, %arg6: memref<1x4xf32, #tpu.memory_space<vmem>>, %arg7: memref<2x4xf32, #tpu.memory_space<vmem>>, %arg8: memref<8x2x128xf32, #tpu.memory_space<vmem>>) attributes {dimension_semantics = [#tpu.dimension_semantics<parallel>], iteration_bounds = array<i64: 1>, scalar_prefetch = 0 : i64, scratch_operands = 1 : i64, tpu.core_type = #tpu.core_type<tc>, window_params = [{transform_indices = @transform_0, window_bounds = array<i64: 2, 8, 16>}, {pipeline_mode = #tpu.pipeline_mode<synchronous>, transform_indices = @transform_1, window_bounds = array<i64: 16, 128>}, {pipeline_mode = #tpu.pipeline_mode<synchronous>, transform_indices = @transform_2, window_bounds = array<i64: 32, 128>}, {pipeline_mode = #tpu.pipeline_mode<synchronous>, transform_indices = @transform_3, window_bounds = array<i64: 1, 128>}, {pipeline_mode = #tpu.pipeline_mode<synchronous>, transform_indices = @transform_4, window_bounds = array<i64: 32, 4>}, {pipeline_mode = #tpu.pipeline_mode<synchronous>, transform_indices = @transform_5, window_bounds = array<i64: 1, 4>}, {transform_indices = @transform_6, window_bounds = array<i64: 2, 4>}]} {
    %c0 = arith.constant 0 : index
    %c0_0 = arith.constant 0 : index
    %c0_1 = arith.constant 0 : index
    %0 = vector.load %arg1[%c0, %c0_0, %c0_1] : memref<2x8x16xf32, #tpu.memory_space<vmem>>, vector<1x8x16xf32>
    %1 = vector.shape_cast %0 : vector<1x8x16xf32> to vector<8x16xf32>
    %c0_2 = arith.constant 0 : index
    %c0_3 = arith.constant 0 : index
    %2 = vector.load %arg2[%c0_2, %c0_3] : memref<16x128xf32, #tpu.memory_space<vmem>>, vector<16x128xf32>
    %cst = arith.constant dense<0.000000e+00> : vector<8x128xf32>
    %3 = tpu.matmul %1, %2, %cst {dimension_numbers = #tpu.dot_dimension_numbers<[1], [0], [0], [1], [0, 0, 1, 1], [], []>} : vector<8x16xf32>, vector<16x128xf32>, vector<8x128xf32> -> vector<8x128xf32>
    %c0_4 = arith.constant 0 : index
    %c0_5 = arith.constant 0 : index
    %4 = vector.load %arg4[%c0_4, %c0_5] : memref<1x128xf32, #tpu.memory_space<vmem>>, vector<1x128xf32>
    %5 = vector.broadcast %4 : vector<1x128xf32> to vector<8x128xf32>
    %6 = arith.addf %3, %5 : vector<8x128xf32>
    %c0_6 = arith.constant 0 : index
    %c0_7 = arith.constant 0 : index
    %c0_8 = arith.constant 0 : index
    %7 = vector.load %arg8[%c0_6, %c0_7, %c0_8] : memref<8x2x128xf32, #tpu.memory_space<vmem>>, vector<8x1x128xf32>
    %8 = vector.shape_cast %7 : vector<8x1x128xf32> to vector<8x128xf32>
    %9 = vector.shape_cast %6 : vector<8x128xf32> to vector<8x1x128xf32>
    tpu.vector_store %arg8[%c0_6, %c0_7, %c0_8], %9 {strides = array<i32>} : memref<8x2x128xf32, #tpu.memory_space<vmem>>, vector<8x1x128xf32>,
    %c1 = arith.constant 1 : index
    %c0_9 = arith.constant 0 : index
    %c0_10 = arith.constant 0 : index
    %10 = vector.load %arg1[%c1, %c0_9, %c0_10] : memref<2x8x16xf32, #tpu.memory_space<vmem>>, vector<1x8x16xf32>
    %11 = vector.shape_cast %10 : vector<1x8x16xf32> to vector<8x16xf32>
    %c0_11 = arith.constant 0 : index
    %c0_12 = arith.constant 0 : index
    %12 = vector.load %arg2[%c0_11, %c0_12] : memref<16x128xf32, #tpu.memory_space<vmem>>, vector<16x128xf32>
    %cst_13 = arith.constant dense<0.000000e+00> : vector<8x128xf32>
    %13 = tpu.matmul %11, %12, %cst_13 {dimension_numbers = #tpu.dot_dimension_numbers<[1], [0], [0], [1], [0, 0, 1, 1], [], []>} : vector<8x16xf32>, vector<16x128xf32>, vector<8x128xf32> -> vector<8x128xf32>
    %c0_14 = arith.constant 0 : index
    %c0_15 = arith.constant 0 : index
    %14 = vector.load %arg4[%c0_14, %c0_15] : memref<1x128xf32, #tpu.memory_space<vmem>>, vector<1x128xf32>
    %15 = vector.broadcast %14 : vector<1x128xf32> to vector<8x128xf32>
    %16 = arith.addf %13, %15 : vector<8x128xf32>
    %c0_16 = arith.constant 0 : index
    %c1_17 = arith.constant 1 : index
    %c0_18 = arith.constant 0 : index
    %17 = vector.load %arg8[%c0_16, %c1_17, %c0_18] : memref<8x2x128xf32, #tpu.memory_space<vmem>>, vector<8x1x128xf32>
    %18 = vector.shape_cast %17 : vector<8x1x128xf32> to vector<8x128xf32>
    %19 = vector.shape_cast %16 : vector<8x128xf32> to vector<8x1x128xf32>
    tpu.vector_store %arg8[%c0_16, %c1_17, %c0_18], %19 {strides = array<i32>} : memref<8x2x128xf32, #tpu.memory_space<vmem>>, vector<8x1x128xf32>,
    %cst_19 = arith.constant 0.000000e+00 : f32
    %20 = vector.broadcast %cst_19 : f32 to vector<2x32xf32>
    %cst_20 = arith.constant 0.000000e+00 : f32
    %21 = vector.broadcast %cst_20 : f32 to vector<2x32xf32>
    %c0_21 = arith.constant 0 : index
    %c0_22 = arith.constant 0 : index
    %c0_23 = arith.constant 0 : index
    %22 = vector.load %arg8[%c0_21, %c0_22, %c0_23] : memref<8x2x128xf32, #tpu.memory_space<vmem>>, vector<1x2x128xf32>
    %23 = vector.shape_cast %22 : vector<1x2x128xf32> to vector<2x128xf32>
    %c0_24 = arith.constant 0 : index
    %c0_25 = arith.constant 0 : index
    %24 = vector.load %arg3[%c0_24, %c0_25] : memref<32x128xf32, #tpu.memory_space<vmem>>, vector<32x128xf32>
    %cst_26 = arith.constant dense<0.000000e+00> : vector<2x128xf32>
    %25 = tpu.matmul %20, %24, %cst_26 {dimension_numbers = #tpu.dot_dimension_numbers<[1], [0], [0], [1], [0, 0, 1, 1], [], []>} : vector<2x32xf32>, vector<32x128xf32>, vector<2x128xf32> -> vector<2x128xf32>
    %26 = arith.addf %23, %25 : vector<2x128xf32>
    %27 = vector.extract_strided_slice %26 {offsets = [0, 0], sizes = [2, 32], strides = [1, 1]} : vector<2x128xf32> to vector<2x32xf32>
    %28 = arith.negf %27 : vector<2x32xf32>
    %29 = math.exp %28 : vector<2x32xf32>
    %cst_27 = arith.constant 1.000000e+00 : f32
    %30 = vector.broadcast %cst_27 : f32 to vector<2x32xf32>
    %31 = arith.addf %30, %29 : vector<2x32xf32>
    %32 = arith.divf %30, %31 : vector<2x32xf32>
    %33 = vector.extract_strided_slice %26 {offsets = [0, 32], sizes = [2, 32], strides = [1, 1]} : vector<2x128xf32> to vector<2x32xf32>
    %34 = arith.negf %33 : vector<2x32xf32>
    %35 = math.exp %34 : vector<2x32xf32>
    %cst_28 = arith.constant 1.000000e+00 : f32
    %36 = vector.broadcast %cst_28 : f32 to vector<2x32xf32>
    %37 = arith.addf %36, %35 : vector<2x32xf32>
    %38 = arith.divf %36, %37 : vector<2x32xf32>
    %39 = vector.extract_strided_slice %26 {offsets = [0, 64], sizes = [2, 32], strides = [1, 1]} : vector<2x128xf32> to vector<2x32xf32>
    %40 = math.tanh %39 : vector<2x32xf32>
    %41 = vector.extract_strided_slice %26 {offsets = [0, 96], sizes = [2, 32], strides = [1, 1]} : vector<2x128xf32> to vector<2x32xf32>
    %42 = arith.negf %41 : vector<2x32xf32>
    %43 = math.exp %42 : vector<2x32xf32>
    %cst_29 = arith.constant 1.000000e+00 : f32
    %44 = vector.broadcast %cst_29 : f32 to vector<2x32xf32>
    %45 = arith.addf %44, %43 : vector<2x32xf32>
    %46 = arith.divf %44, %45 : vector<2x32xf32>
    %47 = arith.mulf %38, %21 : vector<2x32xf32>
    %48 = arith.mulf %32, %40 : vector<2x32xf32>
    %49 = arith.addf %47, %48 : vector<2x32xf32>
    %50 = math.tanh %49 : vector<2x32xf32>
    %51 = arith.mulf %46, %50 : vector<2x32xf32>
    %c1_30 = arith.constant 1 : index
    %c0_31 = arith.constant 0 : index
    %c0_32 = arith.constant 0 : index
    %52 = vector.load %arg8[%c1_30, %c0_31, %c0_32] : memref<8x2x128xf32, #tpu.memory_space<vmem>>, vector<1x2x128xf32>
    %53 = vector.shape_cast %52 : vector<1x2x128xf32> to vector<2x128xf32>
    %c0_33 = arith.constant 0 : index
    %c0_34 = arith.constant 0 : index
    %54 = vector.load %arg3[%c0_33, %c0_34] : memref<32x128xf32, #tpu.memory_space<vmem>>, vector<32x128xf32>
    %cst_35 = arith.constant dense<0.000000e+00> : vector<2x128xf32>
    %55 = tpu.matmul %51, %54, %cst_35 {dimension_numbers = #tpu.dot_dimension_numbers<[1], [0], [0], [1], [0, 0, 1, 1], [], []>} : vector<2x32xf32>, vector<32x128xf32>, vector<2x128xf32> -> vector<2x128xf32>
    %56 = arith.addf %53, %55 : vector<2x128xf32>
    %57 = vector.extract_strided_slice %56 {offsets = [0, 0], sizes = [2, 32], strides = [1, 1]} : vector<2x128xf32> to vector<2x32xf32>
    %58 = arith.negf %57 : vector<2x32xf32>
    %59 = math.exp %58 : vector<2x32xf32>
    %cst_36 = arith.constant 1.000000e+00 : f32
    %60 = vector.broadcast %cst_36 : f32 to vector<2x32xf32>
    %61 = arith.addf %60, %59 : vector<2x32xf32>
    %62 = arith.divf %60, %61 : vector<2x32xf32>
    %63 = vector.extract_strided_slice %56 {offsets = [0, 32], sizes = [2, 32], strides = [1, 1]} : vector<2x128xf32> to vector<2x32xf32>
    %64 = arith.negf %63 : vector<2x32xf32>
    %65 = math.exp %64 : vector<2x32xf32>
    %cst_37 = arith.constant 1.000000e+00 : f32
    %66 = vector.broadcast %cst_37 : f32 to vector<2x32xf32>
    %67 = arith.addf %66, %65 : vector<2x32xf32>
    %68 = arith.divf %66, %67 : vector<2x32xf32>
    %69 = vector.extract_strided_slice %56 {offsets = [0, 64], sizes = [2, 32], strides = [1, 1]} : vector<2x128xf32> to vector<2x32xf32>
    %70 = math.tanh %69 : vector<2x32xf32>
    %71 = vector.extract_strided_slice %56 {offsets = [0, 96], sizes = [2, 32], strides = [1, 1]} : vector<2x128xf32> to vector<2x32xf32>
    %72 = arith.negf %71 : vector<2x32xf32>
    %73 = math.exp %72 : vector<2x32xf32>
    %cst_38 = arith.constant 1.000000e+00 : f32
    %74 = vector.broadcast %cst_38 : f32 to vector<2x32xf32>
    %75 = arith.addf %74, %73 : vector<2x32xf32>
    %76 = arith.divf %74, %75 : vector<2x32xf32>
    %77 = arith.mulf %68, %49 : vector<2x32xf32>
    %78 = arith.mulf %62, %70 : vector<2x32xf32>
    %79 = arith.addf %77, %78 : vector<2x32xf32>
    %80 = math.tanh %79 : vector<2x32xf32>
    %81 = arith.mulf %76, %80 : vector<2x32xf32>
    %c2 = arith.constant 2 : index
    %c0_39 = arith.constant 0 : index
    %c0_40 = arith.constant 0 : index
    %82 = vector.load %arg8[%c2, %c0_39, %c0_40] : memref<8x2x128xf32, #tpu.memory_space<vmem>>, vector<1x2x128xf32>
    %83 = vector.shape_cast %82 : vector<1x2x128xf32> to vector<2x128xf32>
    %c0_41 = arith.constant 0 : index
    %c0_42 = arith.constant 0 : index
    %84 = vector.load %arg3[%c0_41, %c0_42] : memref<32x128xf32, #tpu.memory_space<vmem>>, vector<32x128xf32>
    %cst_43 = arith.constant dense<0.000000e+00> : vector<2x128xf32>
    %85 = tpu.matmul %81, %84, %cst_43 {dimension_numbers = #tpu.dot_dimension_numbers<[1], [0], [0], [1], [0, 0, 1, 1], [], []>} : vector<2x32xf32>, vector<32x128xf32>, vector<2x128xf32> -> vector<2x128xf32>
    %86 = arith.addf %83, %85 : vector<2x128xf32>
    %87 = vector.extract_strided_slice %86 {offsets = [0, 0], sizes = [2, 32], strides = [1, 1]} : vector<2x128xf32> to vector<2x32xf32>
    %88 = arith.negf %87 : vector<2x32xf32>
    %89 = math.exp %88 : vector<2x32xf32>
    %cst_44 = arith.constant 1.000000e+00 : f32
    %90 = vector.broadcast %cst_44 : f32 to vector<2x32xf32>
    %91 = arith.addf %90, %89 : vector<2x32xf32>
    %92 = arith.divf %90, %91 : vector<2x32xf32>
    %93 = vector.extract_strided_slice %86 {offsets = [0, 32], sizes = [2, 32], strides = [1, 1]} : vector<2x128xf32> to vector<2x32xf32>
    %94 = arith.negf %93 : vector<2x32xf32>
    %95 = math.exp %94 : vector<2x32xf32>
    %cst_45 = arith.constant 1.000000e+00 : f32
    %96 = vector.broadcast %cst_45 : f32 to vector<2x32xf32>
    %97 = arith.addf %96, %95 : vector<2x32xf32>
    %98 = arith.divf %96, %97 : vector<2x32xf32>
    %99 = vector.extract_strided_slice %86 {offsets = [0, 64], sizes = [2, 32], strides = [1, 1]} : vector<2x128xf32> to vector<2x32xf32>
    %100 = math.tanh %99 : vector<2x32xf32>
    %101 = vector.extract_strided_slice %86 {offsets = [0, 96], sizes = [2, 32], strides = [1, 1]} : vector<2x128xf32> to vector<2x32xf32>
    %102 = arith.negf %101 : vector<2x32xf32>
    %103 = math.exp %102 : vector<2x32xf32>
    %cst_46 = arith.constant 1.000000e+00 : f32
    %104 = vector.broadcast %cst_46 : f32 to vector<2x32xf32>
    %105 = arith.addf %104, %103 : vector<2x32xf32>
    %106 = arith.divf %104, %105 : vector<2x32xf32>
    %107 = arith.mulf %98, %79 : vector<2x32xf32>
    %108 = arith.mulf %92, %100 : vector<2x32xf32>
    %109 = arith.addf %107, %108 : vector<2x32xf32>
    %110 = math.tanh %109 : vector<2x32xf32>
    %111 = arith.mulf %106, %110 : vector<2x32xf32>
    %c3 = arith.constant 3 : index
    %c0_47 = arith.constant 0 : index
    %c0_48 = arith.constant 0 : index
    %112 = vector.load %arg8[%c3, %c0_47, %c0_48] : memref<8x2x128xf32, #tpu.memory_space<vmem>>, vector<1x2x128xf32>
    %113 = vector.shape_cast %112 : vector<1x2x128xf32> to vector<2x128xf32>
    %c0_49 = arith.constant 0 : index
    %c0_50 = arith.constant 0 : index
    %114 = vector.load %arg3[%c0_49, %c0_50] : memref<32x128xf32, #tpu.memory_space<vmem>>, vector<32x128xf32>
    %cst_51 = arith.constant dense<0.000000e+00> : vector<2x128xf32>
    %115 = tpu.matmul %111, %114, %cst_51 {dimension_numbers = #tpu.dot_dimension_numbers<[1], [0], [0], [1], [0, 0, 1, 1], [], []>} : vector<2x32xf32>, vector<32x128xf32>, vector<2x128xf32> -> vector<2x128xf32>
    %116 = arith.addf %113, %115 : vector<2x128xf32>
    %117 = vector.extract_strided_slice %116 {offsets = [0, 0], sizes = [2, 32], strides = [1, 1]} : vector<2x128xf32> to vector<2x32xf32>
    %118 = arith.negf %117 : vector<2x32xf32>
    %119 = math.exp %118 : vector<2x32xf32>
    %cst_52 = arith.constant 1.000000e+00 : f32
    %120 = vector.broadcast %cst_52 : f32 to vector<2x32xf32>
    %121 = arith.addf %120, %119 : vector<2x32xf32>
    %122 = arith.divf %120, %121 : vector<2x32xf32>
    %123 = vector.extract_strided_slice %116 {offsets = [0, 32], sizes = [2, 32], strides = [1, 1]} : vector<2x128xf32> to vector<2x32xf32>
    %124 = arith.negf %123 : vector<2x32xf32>
    %125 = math.exp %124 : vector<2x32xf32>
    %cst_53 = arith.constant 1.000000e+00 : f32
    %126 = vector.broadcast %cst_53 : f32 to vector<2x32xf32>
    %127 = arith.addf %126, %125 : vector<2x32xf32>
    %128 = arith.divf %126, %127 : vector<2x32xf32>
    %129 = vector.extract_strided_slice %116 {offsets = [0, 64], sizes = [2, 32], strides = [1, 1]} : vector<2x128xf32> to vector<2x32xf32>
    %130 = math.tanh %129 : vector<2x32xf32>
    %131 = vector.extract_strided_slice %116 {offsets = [0, 96], sizes = [2, 32], strides = [1, 1]} : vector<2x128xf32> to vector<2x32xf32>
    %132 = arith.negf %131 : vector<2x32xf32>
    %133 = math.exp %132 : vector<2x32xf32>
    %cst_54 = arith.constant 1.000000e+00 : f32
    %134 = vector.broadcast %cst_54 : f32 to vector<2x32xf32>
    %135 = arith.addf %134, %133 : vector<2x32xf32>
    %136 = arith.divf %134, %135 : vector<2x32xf32>
    %137 = arith.mulf %128, %109 : vector<2x32xf32>
    %138 = arith.mulf %122, %130 : vector<2x32xf32>
    %139 = arith.addf %137, %138 : vector<2x32xf32>
    %140 = math.tanh %139 : vector<2x32xf32>
    %141 = arith.mulf %136, %140 : vector<2x32xf32>
    %c4 = arith.constant 4 : index
    %c0_55 = arith.constant 0 : index
    %c0_56 = arith.constant 0 : index
    %142 = vector.load %arg8[%c4, %c0_55, %c0_56] : memref<8x2x128xf32, #tpu.memory_space<vmem>>, vector<1x2x128xf32>
    %143 = vector.shape_cast %142 : vector<1x2x128xf32> to vector<2x128xf32>
    %c0_57 = arith.constant 0 : index
    %c0_58 = arith.constant 0 : index
    %144 = vector.load %arg3[%c0_57, %c0_58] : memref<32x128xf32, #tpu.memory_space<vmem>>, vector<32x128xf32>
    %cst_59 = arith.constant dense<0.000000e+00> : vector<2x128xf32>
    %145 = tpu.matmul %141, %144, %cst_59 {dimension_numbers = #tpu.dot_dimension_numbers<[1], [0], [0], [1], [0, 0, 1, 1], [], []>} : vector<2x32xf32>, vector<32x128xf32>, vector<2x128xf32> -> vector<2x128xf32>
    %146 = arith.addf %143, %145 : vector<2x128xf32>
    %147 = vector.extract_strided_slice %146 {offsets = [0, 0], sizes = [2, 32], strides = [1, 1]} : vector<2x128xf32> to vector<2x32xf32>
    %148 = arith.negf %147 : vector<2x32xf32>
    %149 = math.exp %148 : vector<2x32xf32>
    %cst_60 = arith.constant 1.000000e+00 : f32
    %150 = vector.broadcast %cst_60 : f32 to vector<2x32xf32>
    %151 = arith.addf %150, %149 : vector<2x32xf32>
    %152 = arith.divf %150, %151 : vector<2x32xf32>
    %153 = vector.extract_strided_slice %146 {offsets = [0, 32], sizes = [2, 32], strides = [1, 1]} : vector<2x128xf32> to vector<2x32xf32>
    %154 = arith.negf %153 : vector<2x32xf32>
    %155 = math.exp %154 : vector<2x32xf32>
    %cst_61 = arith.constant 1.000000e+00 : f32
    %156 = vector.broadcast %cst_61 : f32 to vector<2x32xf32>
    %157 = arith.addf %156, %155 : vector<2x32xf32>
    %158 = arith.divf %156, %157 : vector<2x32xf32>
    %159 = vector.extract_strided_slice %146 {offsets = [0, 64], sizes = [2, 32], strides = [1, 1]} : vector<2x128xf32> to vector<2x32xf32>
    %160 = math.tanh %159 : vector<2x32xf32>
    %161 = vector.extract_strided_slice %146 {offsets = [0, 96], sizes = [2, 32], strides = [1, 1]} : vector<2x128xf32> to vector<2x32xf32>
    %162 = arith.negf %161 : vector<2x32xf32>
    %163 = math.exp %162 : vector<2x32xf32>
    %cst_62 = arith.constant 1.000000e+00 : f32
    %164 = vector.broadcast %cst_62 : f32 to vector<2x32xf32>
    %165 = arith.addf %164, %163 : vector<2x32xf32>
    %166 = arith.divf %164, %165 : vector<2x32xf32>
    %167 = arith.mulf %158, %139 : vector<2x32xf32>
    %168 = arith.mulf %152, %160 : vector<2x32xf32>
    %169 = arith.addf %167, %168 : vector<2x32xf32>
    %170 = math.tanh %169 : vector<2x32xf32>
    %171 = arith.mulf %166, %170 : vector<2x32xf32>
    %c5 = arith.constant 5 : index
    %c0_63 = arith.constant 0 : index
    %c0_64 = arith.constant 0 : index
    %172 = vector.load %arg8[%c5, %c0_63, %c0_64] : memref<8x2x128xf32, #tpu.memory_space<vmem>>, vector<1x2x128xf32>
    %173 = vector.shape_cast %172 : vector<1x2x128xf32> to vector<2x128xf32>
    %c0_65 = arith.constant 0 : index
    %c0_66 = arith.constant 0 : index
    %174 = vector.load %arg3[%c0_65, %c0_66] : memref<32x128xf32, #tpu.memory_space<vmem>>, vector<32x128xf32>
    %cst_67 = arith.constant dense<0.000000e+00> : vector<2x128xf32>
    %175 = tpu.matmul %171, %174, %cst_67 {dimension_numbers = #tpu.dot_dimension_numbers<[1], [0], [0], [1], [0, 0, 1, 1], [], []>} : vector<2x32xf32>, vector<32x128xf32>, vector<2x128xf32> -> vector<2x128xf32>
    %176 = arith.addf %173, %175 : vector<2x128xf32>
    %177 = vector.extract_strided_slice %176 {offsets = [0, 0], sizes = [2, 32], strides = [1, 1]} : vector<2x128xf32> to vector<2x32xf32>
    %178 = arith.negf %177 : vector<2x32xf32>
    %179 = math.exp %178 : vector<2x32xf32>
    %cst_68 = arith.constant 1.000000e+00 : f32
    %180 = vector.broadcast %cst_68 : f32 to vector<2x32xf32>
    %181 = arith.addf %180, %179 : vector<2x32xf32>
    %182 = arith.divf %180, %181 : vector<2x32xf32>
    %183 = vector.extract_strided_slice %176 {offsets = [0, 32], sizes = [2, 32], strides = [1, 1]} : vector<2x128xf32> to vector<2x32xf32>
    %184 = arith.negf %183 : vector<2x32xf32>
    %185 = math.exp %184 : vector<2x32xf32>
    %cst_69 = arith.constant 1.000000e+00 : f32
    %186 = vector.broadcast %cst_69 : f32 to vector<2x32xf32>
    %187 = arith.addf %186, %185 : vector<2x32xf32>
    %188 = arith.divf %186, %187 : vector<2x32xf32>
    %189 = vector.extract_strided_slice %176 {offsets = [0, 64], sizes = [2, 32], strides = [1, 1]} : vector<2x128xf32> to vector<2x32xf32>
    %190 = math.tanh %189 : vector<2x32xf32>
    %191 = vector.extract_strided_slice %176 {offsets = [0, 96], sizes = [2, 32], strides = [1, 1]} : vector<2x128xf32> to vector<2x32xf32>
    %192 = arith.negf %191 : vector<2x32xf32>
    %193 = math.exp %192 : vector<2x32xf32>
    %cst_70 = arith.constant 1.000000e+00 : f32
    %194 = vector.broadcast %cst_70 : f32 to vector<2x32xf32>
    %195 = arith.addf %194, %193 : vector<2x32xf32>
    %196 = arith.divf %194, %195 : vector<2x32xf32>
    %197 = arith.mulf %188, %169 : vector<2x32xf32>
    %198 = arith.mulf %182, %190 : vector<2x32xf32>
    %199 = arith.addf %197, %198 : vector<2x32xf32>
    %200 = math.tanh %199 : vector<2x32xf32>
    %201 = arith.mulf %196, %200 : vector<2x32xf32>
    %c6 = arith.constant 6 : index
    %c0_71 = arith.constant 0 : index
    %c0_72 = arith.constant 0 : index
    %202 = vector.load %arg8[%c6, %c0_71, %c0_72] : memref<8x2x128xf32, #tpu.memory_space<vmem>>, vector<1x2x128xf32>
    %203 = vector.shape_cast %202 : vector<1x2x128xf32> to vector<2x128xf32>
    %c0_73 = arith.constant 0 : index
    %c0_74 = arith.constant 0 : index
    %204 = vector.load %arg3[%c0_73, %c0_74] : memref<32x128xf32, #tpu.memory_space<vmem>>, vector<32x128xf32>
    %cst_75 = arith.constant dense<0.000000e+00> : vector<2x128xf32>
    %205 = tpu.matmul %201, %204, %cst_75 {dimension_numbers = #tpu.dot_dimension_numbers<[1], [0], [0], [1], [0, 0, 1, 1], [], []>} : vector<2x32xf32>, vector<32x128xf32>, vector<2x128xf32> -> vector<2x128xf32>
    %206 = arith.addf %203, %205 : vector<2x128xf32>
    %207 = vector.extract_strided_slice %206 {offsets = [0, 0], sizes = [2, 32], strides = [1, 1]} : vector<2x128xf32> to vector<2x32xf32>
    %208 = arith.negf %207 : vector<2x32xf32>
    %209 = math.exp %208 : vector<2x32xf32>
    %cst_76 = arith.constant 1.000000e+00 : f32
    %210 = vector.broadcast %cst_76 : f32 to vector<2x32xf32>
    %211 = arith.addf %210, %209 : vector<2x32xf32>
    %212 = arith.divf %210, %211 : vector<2x32xf32>
    %213 = vector.extract_strided_slice %206 {offsets = [0, 32], sizes = [2, 32], strides = [1, 1]} : vector<2x128xf32> to vector<2x32xf32>
    %214 = arith.negf %213 : vector<2x32xf32>
    %215 = math.exp %214 : vector<2x32xf32>
    %cst_77 = arith.constant 1.000000e+00 : f32
    %216 = vector.broadcast %cst_77 : f32 to vector<2x32xf32>
    %217 = arith.addf %216, %215 : vector<2x32xf32>
    %218 = arith.divf %216, %217 : vector<2x32xf32>
    %219 = vector.extract_strided_slice %206 {offsets = [0, 64], sizes = [2, 32], strides = [1, 1]} : vector<2x128xf32> to vector<2x32xf32>
    %220 = math.tanh %219 : vector<2x32xf32>
    %221 = vector.extract_strided_slice %206 {offsets = [0, 96], sizes = [2, 32], strides = [1, 1]} : vector<2x128xf32> to vector<2x32xf32>
    %222 = arith.negf %221 : vector<2x32xf32>
    %223 = math.exp %222 : vector<2x32xf32>
    %cst_78 = arith.constant 1.000000e+00 : f32
    %224 = vector.broadcast %cst_78 : f32 to vector<2x32xf32>
    %225 = arith.addf %224, %223 : vector<2x32xf32>
    %226 = arith.divf %224, %225 : vector<2x32xf32>
    %227 = arith.mulf %218, %199 : vector<2x32xf32>
    %228 = arith.mulf %212, %220 : vector<2x32xf32>
    %229 = arith.addf %227, %228 : vector<2x32xf32>
    %230 = math.tanh %229 : vector<2x32xf32>
    %231 = arith.mulf %226, %230 : vector<2x32xf32>
    %c7 = arith.constant 7 : index
    %c0_79 = arith.constant 0 : index
    %c0_80 = arith.constant 0 : index
    %232 = vector.load %arg8[%c7, %c0_79, %c0_80] : memref<8x2x128xf32, #tpu.memory_space<vmem>>, vector<1x2x128xf32>
    %233 = vector.shape_cast %232 : vector<1x2x128xf32> to vector<2x128xf32>
    %c0_81 = arith.constant 0 : index
    %c0_82 = arith.constant 0 : index
    %234 = vector.load %arg3[%c0_81, %c0_82] : memref<32x128xf32, #tpu.memory_space<vmem>>, vector<32x128xf32>
    %cst_83 = arith.constant dense<0.000000e+00> : vector<2x128xf32>
    %235 = tpu.matmul %231, %234, %cst_83 {dimension_numbers = #tpu.dot_dimension_numbers<[1], [0], [0], [1], [0, 0, 1, 1], [], []>} : vector<2x32xf32>, vector<32x128xf32>, vector<2x128xf32> -> vector<2x128xf32>
    %236 = arith.addf %233, %235 : vector<2x128xf32>
    %237 = vector.extract_strided_slice %236 {offsets = [0, 0], sizes = [2, 32], strides = [1, 1]} : vector<2x128xf32> to vector<2x32xf32>
    %238 = arith.negf %237 : vector<2x32xf32>
    %239 = math.exp %238 : vector<2x32xf32>
    %cst_84 = arith.constant 1.000000e+00 : f32
    %240 = vector.broadcast %cst_84 : f32 to vector<2x32xf32>
    %241 = arith.addf %240, %239 : vector<2x32xf32>
    %242 = arith.divf %240, %241 : vector<2x32xf32>
    %243 = vector.extract_strided_slice %236 {offsets = [0, 32], sizes = [2, 32], strides = [1, 1]} : vector<2x128xf32> to vector<2x32xf32>
    %244 = arith.negf %243 : vector<2x32xf32>
    %245 = math.exp %244 : vector<2x32xf32>
    %cst_85 = arith.constant 1.000000e+00 : f32
    %246 = vector.broadcast %cst_85 : f32 to vector<2x32xf32>
    %247 = arith.addf %246, %245 : vector<2x32xf32>
    %248 = arith.divf %246, %247 : vector<2x32xf32>
    %249 = vector.extract_strided_slice %236 {offsets = [0, 64], sizes = [2, 32], strides = [1, 1]} : vector<2x128xf32> to vector<2x32xf32>
    %250 = math.tanh %249 : vector<2x32xf32>
    %251 = vector.extract_strided_slice %236 {offsets = [0, 96], sizes = [2, 32], strides = [1, 1]} : vector<2x128xf32> to vector<2x32xf32>
    %252 = arith.negf %251 : vector<2x32xf32>
    %253 = math.exp %252 : vector<2x32xf32>
    %cst_86 = arith.constant 1.000000e+00 : f32
    %254 = vector.broadcast %cst_86 : f32 to vector<2x32xf32>
    %255 = arith.addf %254, %253 : vector<2x32xf32>
    %256 = arith.divf %254, %255 : vector<2x32xf32>
    %257 = arith.mulf %248, %229 : vector<2x32xf32>
    %258 = arith.mulf %242, %250 : vector<2x32xf32>
    %259 = arith.addf %257, %258 : vector<2x32xf32>
    %260 = math.tanh %259 : vector<2x32xf32>
    %261 = arith.mulf %256, %260 : vector<2x32xf32>
    %c0_87 = arith.constant 0 : index
    %c0_88 = arith.constant 0 : index
    %262 = vector.load %arg5[%c0_87, %c0_88] : memref<32x4xf32, #tpu.memory_space<vmem>>, vector<32x4xf32>
    %cst_89 = arith.constant dense<0.000000e+00> : vector<2x4xf32>
    %263 = tpu.matmul %261, %262, %cst_89 {dimension_numbers = #tpu.dot_dimension_numbers<[1], [0], [0], [1], [0, 0, 1, 1], [], []>} : vector<2x32xf32>, vector<32x4xf32>, vector<2x4xf32> -> vector<2x4xf32>
    %c0_90 = arith.constant 0 : index
    %c0_91 = arith.constant 0 : index
    %264 = vector.load %arg6[%c0_90, %c0_91] : memref<1x4xf32, #tpu.memory_space<vmem>>, vector<1x4xf32>
    %265 = vector.broadcast %264 : vector<1x4xf32> to vector<2x4xf32>
    %266 = arith.addf %263, %265 : vector<2x4xf32>
    %c0_92 = arith.constant 0 : index
    %c0_93 = arith.constant 0 : index
    %267 = vector.load %arg7[%c0_92, %c0_93] : memref<2x4xf32, #tpu.memory_space<vmem>>, vector<2x4xf32>
    tpu.vector_store %arg7[%c0_92, %c0_93], %266 {strides = array<i32>} : memref<2x4xf32, #tpu.memory_space<vmem>>, vector<2x4xf32>,
    return
  }
  func.func @transform_0(%arg0: i32) -> (i32, i32, i32) {
    %c0_i32 = arith.constant 0 : i32
    %c0_i32_0 = arith.constant 0 : i32
    %c0_i32_1 = arith.constant 0 : i32
    return %arg0, %c0_i32, %c0_i32_0 : i32, i32, i32
  }
  func.func @transform_1(%arg0: i32) -> (i32, i32) {
    %c0_i32 = arith.constant 0 : i32
    %c0_i32_0 = arith.constant 0 : i32
    %c0_i32_1 = arith.constant 0 : i32
    return %c0_i32, %c0_i32_0 : i32, i32
  }
  func.func @transform_2(%arg0: i32) -> (i32, i32) {
    %c0_i32 = arith.constant 0 : i32
    %c0_i32_0 = arith.constant 0 : i32
    %c0_i32_1 = arith.constant 0 : i32
    return %c0_i32, %c0_i32_0 : i32, i32
  }
  func.func @transform_3(%arg0: i32) -> (i32, i32) {
    %c0_i32 = arith.constant 0 : i32
    %c0_i32_0 = arith.constant 0 : i32
    %c0_i32_1 = arith.constant 0 : i32
    return %c0_i32, %c0_i32_0 : i32, i32
  }
  func.func @transform_4(%arg0: i32) -> (i32, i32) {
    %c0_i32 = arith.constant 0 : i32
    %c0_i32_0 = arith.constant 0 : i32
    %c0_i32_1 = arith.constant 0 : i32
    return %c0_i32, %c0_i32_0 : i32, i32
  }
  func.func @transform_5(%arg0: i32) -> (i32, i32) {
    %c0_i32 = arith.constant 0 : i32
    %c0_i32_0 = arith.constant 0 : i32
    %c0_i32_1 = arith.constant 0 : i32
    return %c0_i32, %c0_i32_0 : i32, i32
  }
  func.func @transform_6(%arg0: i32) -> (i32, i32) {
    %c0_i32 = arith.constant 0 : i32
    %c0_i32_0 = arith.constant 0 : i32
    return %arg0, %c0_i32 : i32, i32
  }
}

</mosaic_0001>

<bundles_post_ra>
// kernel: tpu_custom_call.1
= control target key start
LH: loop header
LB: loop body
LE: loop exit
PB: predicated region body
PF: predicated region fallthrough
CT: control target
= control target key end

     0   :  { %11 = vsyncpa [#allocation4], 0  ;;  %s1889_s0 = inlined_call_operand.hbm [shape: f32[2,8,16], index: 0, kind: input, shape index: {}]   ;;  %s1890_s1 = inlined_call_operand.hbm [shape: f32[16,128], index: 1, kind: input, shape index: {}]   ;;  %s1891_s2 = inlined_call_operand.vmem [shape: f32[32,128], index: 2, kind: input, shape index: {}]   ;;  %s1892_s3 = inlined_call_operand.vmem [shape: f32[1,128], index: 3, kind: input, shape index: {}]   ;;  %s1893_s4 = inlined_call_operand.vmem [shape: f32[32,4], index: 4, kind: input, shape index: {}]   ;;  %s1894_s5 = inlined_call_operand.vmem [shape: f32[1,4], index: 5, kind: input, shape index: {}]   ;;  %s1895_s6 = inlined_call_operand.hbm [shape: f32[2,4], index: 6, kind: output, shape index: {}]  }
   0x1   :  { %12 = vsyncpa [#allocation7], 0 }
   0x2   :  { %13 = vsyncpa [#allocation5], 0  ;;  %s1674_s21 = smov [#allocation3]   ;;  %s1602_s25 = scalar_lea.hbm %s1889_s0, 256 }
   0x3   :  { %s19_s22 = sshll.u32 %s1674_s21, 4  ;;  %p1603_p0 = scmp.ne.s32.totalorder %s1889_s0, %s1602_s25  ;;  %s20_s22 = int_to_ptr.vmem [resolvable:$true] %s19_s22 }
   0x4   :  { %p1606_p1 = scmp.lt.u32.totalorder %s1602_s25, %s1889_s0 }
   0x6   :  { %p1608_p2 = pnand %p1606_p1, %p1603_p0 }
   0x8   :  { %1611 = shalt.err (!%p1608_p2)
}
   0x9   :  { %s1612_s30 = scalar_lea.vmem %s20_s22, 256  ;;  %p1617_p4 = scmp.lt.s32.totalorder %s20_s22, %s20_s22 }
   0xa   :  { %p1613_p3 = scmp.ne.s32.totalorder %s20_s22, %s1612_s30  ;;  %p1618_p5 = scmp.lt.s32.totalorder %s1612_s30, %s1612_s30 }
   0xc   :  { %p1619_p6 = por %p1618_p5, %p1617_p4 }
   0xe   :  { %p1620_p7 = pnand %p1619_p6, %p1613_p3 }
  0x10   :  { %1623 = shalt.err (!%p1620_p7)
}
  0x11   :  { %s1675_s7 = smov 128   ;;  %s1676_s8 = smov 8  }
  0x12   :  { %25 = dma.hbm_to_vmem [thread:$0]  %s1889_s0, 256, %s20_s22, [#allocation4], %s1675_s7, %s1675_s7, %s1676_s8  }
  0x13   :  { %s1677_s11 = smov [#allocation6]   ;;  %s1624_s15 = scalar_lea.hbm %s1890_s1, 256 }
  0x14   :  { %s31_s12 = sshll.u32 %s1677_s11, 4  ;;  %p1625_p8 = scmp.ne.s32.totalorder %s1890_s1, %s1624_s15  ;;  %s32_s12 = int_to_ptr.vmem [resolvable:$true] %s31_s12 }
  0x15   :  { %p1628_p9 = scmp.lt.u32.totalorder %s1624_s15, %s1890_s1 }
  0x17   :  { %p1630_p10 = pnand %p1628_p9, %p1625_p8 }
  0x19   :  { %1633 = shalt.err (!%p1630_p10)
}
  0x1a   :  { %s1634_s20 = scalar_lea.vmem %s32_s12, 256  ;;  %p1639_p12 = scmp.lt.s32.totalorder %s32_s12, %s32_s12 }
  0x1b   :  { %p1635_p11 = scmp.ne.s32.totalorder %s32_s12, %s1634_s20  ;;  %p1640_p13 = scmp.lt.s32.totalorder %s1634_s20, %s1634_s20 }
  0x1d   :  { %p1641_p0 = por %p1640_p13, %p1639_p12 }
  0x1f   :  { %p1642_p1 = pnand %p1641_p0, %p1635_p11 }
  0x21   :  { %1645 = shalt.err (!%p1642_p1)
}
  0x22   :  { %37 = dma.hbm_to_vmem [thread:$0]  %s1890_s1, 256, %s32_s12, [#allocation7], %s1675_s7, %s1675_s7, %s1676_s8  }
  0x23   :  { %1668 = dma.done.wait [#allocation4], 256  }
  0x24   :  { %1669 = vsyncadd [#allocation4], 4294967040 }
  0x25   :  { %1670 = dma.done.wait [#allocation7], 256  }
  0x26   :  { %1671 = vsyncadd [#allocation7], 4294967040  ;;  %v1678_v0 = vmov 0.0|0.0   ;;  %vm1679_vm0 = vmmov 0   ;;  %v1680_v1 = vmov 0.0   ;;  %v53_v2 = vld [vmem:[#allocation6] sm:$0xff]  ;;  %v141_v15 = vlaneseq }
  0x27   :  { %1467 = vmatprep.subr.bf16.mxu1 %v1678_v0  ;;  %1358 = vmatprep.mubr.msk.f32.mxu1 %vm1679_vm0, %v1680_v1  ;;  %v54_v3 = vld [vmem:[#allocation6 + $0x8] sm:$0xff]  ;;  %v353_v5 = vld [vmem:[%s1891_s2] sm:$0xff]  ;;  %v355_v8 = vld [vmem:[%s1891_s2 + $0x10] sm:$0xff]  ;;  %vm62_vm1 = vcmask 130048   ;;  %v1681_v13 = vmov 1966171168  }
  0x28   :  { %1473 = vmatprep.subr.bf16.mxu0 %v1678_v0  ;;  %1376 = vmatprep.mubr.msk.f32.mxu0 %vm1679_vm0, %v1680_v1  ;;  %v1468_v4 = vpack.c.bf16 %v54_v3, %v53_v2  ;;  %v354_v6 = vld [vmem:[%s1891_s2 + $0x8] sm:$0xff]  ;;  %v356_v9 = vld [vmem:[%s1891_s2 + $0x18] sm:$0xff]  ;;  %v52_v10 = vld [vmem:[#allocation3] sm:$0xff]  ;;  %v139_v14 = vunpack.c.l.s4 %v1681_v13  ;;  %v142_v17 = vshrl.u32 %v141_v15, 7  ;;  %s1683_s30 = smov 32   ;;  %vm357_vm2 = vcmask 261120  }
  0x29   :  { %v1756_v7 = vpack.c.bf16 %v354_v6, %v353_v5  ;;  %v1766_v11 = vpack.c.bf16 %v356_v9, %v355_v8  ;;  %v203_v12 = vld [vmem:[#allocation3 + $0x8] sm:$0xff]  ;;  %v1274_v18 = vld [vmem:[%s1892_s3] ss:$0 sm:$0xff]  ;;  %s1682_s3 = smov 64   ;;  %vm1256_vm3 = vcmask 25600  }
  0x2a   :  { %1469 = vmatpush3.bf16.msra.mxu1 %v1468_v4  ;;  %v140_v16 = vunpack.c.0.s8 %v139_v14 }
  0x2b   :  { %1470 = vmatprep.subr.bf16.mxu1 %v1678_v0  ;;  %1475 = vmatpush3.bf16.msra.mxu0 %v1756_v7 }
  0x2c   :  { %1476 = vmatprep.subr.bf16.mxu0 %v1678_v0  ;;  %v143_v19 = vsub.s32 %v140_v16, %v142_v17 }
  0x2d   :  { %1359 = vmatmul.mubr.msk.f32.vlgmr.msra.gmra.mrb[0].mxu1 %vm62_vm1, %v52_v10 }
  0x2e   :  { %1472 = vmatpush3.bf16.msra.mxu1 %v1468_v4  ;;  %1365 = vmatprep.mubr.msk.f32.mxu1 %vm1679_vm0, %v1680_v1 }
  0x2f   :  { %1478 = vmatpush3.bf16.msra.mxu0 %v1766_v11  ;;  %1479 = vmatprep.subr.bf16.mxu1 %v1678_v0 }
  0x30   :  { %1485 = vmatprep.subr.bf16.mxu0 %v1678_v0 }
  0x31   :  { %1366 = vmatmul.mubr.msk.f32.vlgmr.msra.gmra.mrb[2].mxu1 %vm62_vm1, %v203_v12 }
  0x32   :  { %1377 = vmatmul.mubr.f32.vlgmr.msra.gmra.mrb[0].mxu0 %v1680_v1  ;;  %1481 = vmatpush3.bf16.msra.mxu1 %v1756_v7 }
  0x33   :  { %1482 = vmatprep.subr.bf16.mxu1 %v1678_v0  ;;  %1387 = vmatprep.mubr.msk.f32.mxu1 %vm1679_vm0, %v1680_v1 }
  0x34   :  { %1487 = vmatpush3.bf16.msra.mxu0 %v1756_v7  ;;  %1398 = vmatprep.mubr.msk.f32.mxu0 %vm1679_vm0, %v1680_v1 }
  0x35   :  { %1488 = vmatprep.subr.bf16.mxu0 %v1678_v0 }
  0x36   :  { %1484 = vmatpush3.bf16.msra.mxu1 %v1766_v11 }
  0x37   :  { %1491 = vmatprep.subr.bf16.mxu1 %v1678_v0 }
  0x38   :  { %1490 = vmatpush3.bf16.msra.mxu0 %v1766_v11 }
  0x39   :  { %1497 = vmatprep.subr.bf16.mxu0 %v1678_v0 }
 0x100   :  { %v132_v20 = vpop.f32.mrb[0].mxu1 }
 0x101   :  { %v133_v21 = vadd.f32 %v1274_v18, %v132_v20  ;;  %v1360_v22 = vpop.f32.mrb[1].mxu1 }
 0x103   :  { %v137_v23 = vcombine.high %v133_v21, %v133_v21  ;;  %v144_v24 = vrot.slane %v133_v21, %v143_v19 }
 0x104   :  { %v282_v25 = vpop.f32.mrb[2].mxu1 }
 0x105   :  { %v151_v26 = vrot.slane %v137_v23, %v143_v19  ;;  %v152_v27 = vcombine.high %v144_v24, %v144_v24  ;;  %v160_v28 = vrot.slane %v144_v24, %v143_v19  ;;  %1276 = vst.sshfl [vmem:[#allocation2] sm:$0x1 pattern:$0x73625140] %v144_v24  ;;  %v283_v29 = vadd.f32 %v1274_v18, %v282_v25  ;;  %v1367_v30 = vpop.f32.mrb[3].mxu1  ;;  %v427_v31 = vpop.f32.mrb[0].mxu0 }
 0x106   :  { %v1378_v32 = vpop.f32.mrb[1].mxu0 }
 0x107   :  { %v153_v33 = vcombine.high %v151_v26, %v151_v26  ;;  %v167_v34 = vrot.slane %v151_v26, %v143_v19  ;;  %v174_v35 = vrot.slane %v152_v27, %v143_v19  ;;  %v182_v36 = vcombine.high %v160_v28, %v160_v28  ;;  %1277 = vst.sshfl [vmem:[#allocation2 + $0x2] sm:$0x1 pattern:$0x73625140] %v152_v27 }
 0x108   :  { %1278 = vst.sshfl [vmem:[#allocation2 + $0x8] sm:$0x1 pattern:$0x73625140] %v151_v26  ;;  %v287_v37 = vcombine.high %v283_v29, %v283_v29  ;;  %v294_v38 = vrot.slane %v283_v29, %v143_v19 }
 0x109   :  { %v181_v39 = vrot.slane %v153_v33, %v143_v19  ;;  %v183_v40 = vcombine.high %v167_v34, %v167_v34  ;;  %v184_v41 = vcombine.high %v174_v35, %v174_v35  ;;  %196 = vst [vmem:[#allocation2 + $0x4] sm:$0x1] %v182_v36  ;;  %1279 = vst.sshfl [vmem:[#allocation2 + $0xa] sm:$0x1 pattern:$0x73625140] %v153_v33 }
 0x10a   :  { %v301_v42 = vrot.slane %v287_v37, %v143_v19  ;;  %v302_v43 = vcombine.high %v294_v38, %v294_v38  ;;  %v310_v44 = vrot.slane %v294_v38, %v143_v19  ;;  %1282 = vst.sshfl [vmem:[#allocation2 + $0x1] sm:$0x1 pattern:$0x73625140] %v294_v38 }
 0x10b   :  { %v185_v45 = vcombine.high %v181_v39, %v181_v39  ;;  %197 = vst [vmem:[#allocation2 + $0x6] sm:$0x1] %v184_v41  ;;  %200 = vst [vmem:[#allocation2 + $0xc] sm:$0x1] %v183_v40 }
 0x10c   :  { %v303_v46 = vcombine.high %v301_v42, %v301_v42  ;;  %v317_v47 = vrot.slane %v301_v42, %v143_v19  ;;  %v324_v48 = vrot.slane %v302_v43, %v143_v19  ;;  %v332_v49 = vcombine.high %v310_v44, %v310_v44  ;;  %1283 = vst.sshfl [vmem:[#allocation2 + $0x3] sm:$0x1 pattern:$0x73625140] %v302_v43 }
 0x10d   :  { %1284 = vst.sshfl [vmem:[#allocation2 + $0x9] sm:$0x1 pattern:$0x73625140] %v301_v42  ;;  %201 = vst [vmem:[#allocation2 + $0xe] sm:$0x1] %v185_v45 }
 0x10e   :  { %v331_v50 = vrot.slane %v303_v46, %v143_v19  ;;  %v333_v51 = vcombine.high %v317_v47, %v317_v47  ;;  %v334_v52 = vcombine.high %v324_v48, %v324_v48  ;;  %346 = vst [vmem:[#allocation2 + $0x5] sm:$0x1] %v332_v49  ;;  %1285 = vst.sshfl [vmem:[#allocation2 + $0xb] sm:$0x1 pattern:$0x73625140] %v303_v46 }
 0x110   :  { %v335_v53 = vcombine.high %v331_v50, %v331_v50  ;;  %347 = vst [vmem:[#allocation2 + $0x7] sm:$0x1] %v334_v52  ;;  %350 = vst [vmem:[#allocation2 + $0xd] sm:$0x1] %v333_v51 }
 0x111   :  { %v352_v54 = vld [vmem:[#allocation2] sm:$0x3] }
 0x112   :  { %351 = vst [vmem:[#allocation2 + $0xf] sm:$0x1] %v335_v53  ;;  %v431_v55 = vadd.f32 %v427_v31, %v352_v54 }
 0x113   :  { %v457_v9 = vld [vmem:[#allocation2 + $0x2] sm:$0x3] }
 0x114   :  { %1538 = vtanh.f32 %v431_v55  ;;  %v1286_v57 = vmul.f32 -1.442695, %v431_v55 }
 0x115   :  { %v559_v28 = vld [vmem:[#allocation2 + $0x4] sm:$0x3] }
 0x116   :  { %1540 = vpow2.f32 %v1286_v57 }
 0x117   :  { %v661_v46 = vld [vmem:[#allocation2 + $0x6] sm:$0x3] }
 0x11e   :  { %v1539_v56 = vpop.eup %1538 }
 0x11f   :  { %441 = vrot.lane.b32.xlu0 %v1539_v56, %s1682_s3 }
 0x120   :  { %v1541_v58 = vpop.eup %1540 }
 0x121   :  { %v435_v59 = vadd.f32 1.0, %v1541_v58 }
 0x123   :  { %1542 = vrcp.f32 %v435_v59 }
 0x12d   :  { %v1543_v60 = vpop.eup %1542 }
 0x12e   :  { %v439_v63 = vmul.f32 0.0, %v1543_v60 }
 0x191   :  { %v442_v61 = vpop.permute.xlu0 %441 }
 0x192   :  { %v444_v62 = vmul.f32 %v1543_v60, %v442_v61 }
 0x194   :  { %446 = vrot.lane.b32.xlu0 %v444_v62, %s1683_s30 }
 0x206   :  { %v447_v2 = vpop.permute.xlu0 %446 }
 0x207   :  { %v449_v3 = vadd.f32 %v447_v2, %v439_v63  ;;  %v763_v2 = vld [vmem:[#allocation2 + $0x8] sm:$0x3] }
 0x209   :  { %1544 = vtanh.f32 %v449_v3 }
 0x213   :  { %v1545_v4 = vpop.eup %1544 }
 0x214   :  { %452 = vrot.lane.b32.xlu1 %v1545_v4, %s1682_s3 }
 0x286   :  { %v453_v5 = vpop.permute.xlu1 %452 }
 0x287   :  { %v455_v6 = vmul.f32 %v1543_v60, %v453_v5 }
 0x289   :  { %459 = vrot.lane.b32.xlu1 %v455_v6, %s1683_s30 }
 0x2fb   :  { %v460_v8 = vpop.permute.xlu1 %459 }
 0x2fc   :  { %1388 = vmatmul.mubr.msk.f32.vlgmr.msra.gmra.mrb[4].mxu1 %vm357_vm2, %v460_v8 }
 0x2fd   :  { %1493 = vmatpush3.bf16.msra.mxu1 %v1756_v7  ;;  %1409 = vmatprep.mubr.msk.f32.mxu1 %vm1679_vm0, %v1680_v1 }
 0x2fe   :  { %1494 = vmatprep.subr.bf16.mxu1 %v1678_v0 }
 0x301   :  { %1496 = vmatpush3.bf16.msra.mxu1 %v1766_v11 }
 0x302   :  { %1503 = vmatprep.subr.bf16.mxu1 %v1678_v0 }
 0x3cf   :  { %v529_v10 = vpop.f32.mrb[4].mxu1 }
 0x3d0   :  { %v533_v12 = vadd.f32 %v529_v10, %v457_v9  ;;  %v1389_v13 = vpop.f32.mrb[5].mxu1 }
 0x3d2   :  { %1546 = vtanh.f32 %v533_v12  ;;  %v1288_v15 = vmul.f32 -1.442695, %v533_v12 }
 0x3d4   :  { %1548 = vpow2.f32 %v1288_v15 }
 0x3dc   :  { %v1547_v14 = vpop.eup %1546 }
 0x3dd   :  { %543 = vrot.lane.b32.xlu0 %v1547_v14, %s1682_s3 }
 0x3de   :  { %v1549_v16 = vpop.eup %1548 }
 0x3df   :  { %v537_v17 = vadd.f32 1.0, %v1549_v16 }
 0x3e1   :  { %1550 = vrcp.f32 %v537_v17 }
 0x3eb   :  { %v1551_v18 = vpop.eup %1550 }
 0x3ec   :  { %v541_v21 = vmul.f32 %v1551_v18, %v449_v3 }
 0x44f   :  { %v544_v19 = vpop.permute.xlu0 %543 }
 0x450   :  { %v546_v20 = vmul.f32 %v1551_v18, %v544_v19 }
 0x452   :  { %548 = vrot.lane.b32.xlu1 %v546_v20, %s1683_s30 }
 0x4c4   :  { %v549_v22 = vpop.permute.xlu1 %548 }
 0x4c5   :  { %v551_v23 = vadd.f32 %v549_v22, %v541_v21  ;;  %v865_v22 = vld [vmem:[#allocation2 + $0xa] sm:$0x3] }
 0x4c7   :  { %1552 = vtanh.f32 %v551_v23 }
 0x4d1   :  { %v1553_v24 = vpop.eup %1552 }
 0x4d2   :  { %554 = vrot.lane.b32.xlu0 %v1553_v24, %s1682_s3 }
 0x544   :  { %v555_v25 = vpop.permute.xlu0 %554 }
 0x545   :  { %v557_v26 = vmul.f32 %v1551_v18, %v555_v25 }
 0x547   :  { %561 = vrot.lane.b32.xlu1 %v557_v26, %s1683_s30 }
 0x5b9   :  { %v562_v27 = vpop.permute.xlu1 %561 }
 0x5ba   :  { %1399 = vmatmul.mubr.msk.f32.vlgmr.msra.gmra.mrb[2].mxu0 %vm357_vm2, %v562_v27 }
 0x5bb   :  { %1499 = vmatpush3.bf16.msra.mxu0 %v1756_v7  ;;  %1420 = vmatprep.mubr.msk.f32.mxu0 %vm1679_vm0, %v1680_v1 }
 0x5bc   :  { %1500 = vmatprep.subr.bf16.mxu0 %v1678_v0 }
 0x5bf   :  { %1502 = vmatpush3.bf16.msra.mxu0 %v1766_v11 }
 0x5c0   :  { %1509 = vmatprep.subr.bf16.mxu0 %v1678_v0 }
 0x68d   :  { %v631_v29 = vpop.f32.mrb[2].mxu0 }
 0x68e   :  { %v635_v30 = vadd.f32 %v631_v29, %v559_v28  ;;  %v1400_v31 = vpop.f32.mrb[3].mxu0 }
 0x690   :  { %1554 = vtanh.f32 %v635_v30  ;;  %v1290_v33 = vmul.f32 -1.442695, %v635_v30 }
 0x692   :  { %1556 = vpow2.f32 %v1290_v33 }
 0x69a   :  { %v1555_v32 = vpop.eup %1554 }
 0x69b   :  { %645 = vrot.lane.b32.xlu0 %v1555_v32, %s1682_s3 }
 0x69c   :  { %v1557_v34 = vpop.eup %1556 }
 0x69d   :  { %v639_v35 = vadd.f32 1.0, %v1557_v34 }
 0x69f   :  { %1558 = vrcp.f32 %v639_v35 }
 0x6a9   :  { %v1559_v36 = vpop.eup %1558 }
 0x6aa   :  { %v643_v39 = vmul.f32 %v1559_v36, %v551_v23 }
 0x70d   :  { %v646_v37 = vpop.permute.xlu0 %645 }
 0x70e   :  { %v648_v38 = vmul.f32 %v1559_v36, %v646_v37 }
 0x710   :  { %650 = vrot.lane.b32.xlu1 %v648_v38, %s1683_s30  ;;  %v967_v38 = vld [vmem:[#allocation2 + $0xc] sm:$0x3] }
 0x782   :  { %v651_v40 = vpop.permute.xlu1 %650 }
 0x783   :  { %v653_v41 = vadd.f32 %v651_v40, %v643_v39 }
 0x785   :  { %1560 = vtanh.f32 %v653_v41 }
 0x78f   :  { %v1561_v42 = vpop.eup %1560 }
 0x790   :  { %656 = vrot.lane.b32.xlu0 %v1561_v42, %s1682_s3 }
 0x802   :  { %v657_v43 = vpop.permute.xlu0 %656 }
 0x803   :  { %v659_v44 = vmul.f32 %v1559_v36, %v657_v43 }
 0x805   :  { %663 = vrot.lane.b32.xlu1 %v659_v44, %s1683_s30 }
 0x877   :  { %v664_v45 = vpop.permute.xlu1 %663 }
 0x878   :  { %1410 = vmatmul.mubr.msk.f32.vlgmr.msra.gmra.mrb[6].mxu1 %vm357_vm2, %v664_v45 }
 0x879   :  { %1505 = vmatpush3.bf16.msra.mxu1 %v1756_v7  ;;  %1431 = vmatprep.mubr.msk.f32.mxu1 %vm1679_vm0, %v1680_v1 }
 0x87a   :  { %1506 = vmatprep.subr.bf16.mxu1 %v1678_v0 }
 0x87d   :  { %1508 = vmatpush3.bf16.msra.mxu1 %v1766_v11 }
 0x87e   :  { %1515 = vmatprep.subr.bf16.mxu1 %v1678_v0 }
 0x94b   :  { %v733_v47 = vpop.f32.mrb[6].mxu1 }
 0x94c   :  { %v737_v48 = vadd.f32 %v733_v47, %v661_v46  ;;  %v1411_v49 = vpop.f32.mrb[7].mxu1 }
 0x94e   :  { %1562 = vtanh.f32 %v737_v48  ;;  %v1292_v51 = vmul.f32 -1.442695, %v737_v48 }
 0x950   :  { %1564 = vpow2.f32 %v1292_v51 }
 0x958   :  { %v1563_v50 = vpop.eup %1562 }
 0x959   :  { %747 = vrot.lane.b32.xlu0 %v1563_v50, %s1682_s3 }
 0x95a   :  { %v1565_v52 = vpop.eup %1564 }
 0x95b   :  { %v741_v53 = vadd.f32 1.0, %v1565_v52 }
 0x95d   :  { %1566 = vrcp.f32 %v741_v53 }
 0x967   :  { %v1567_v54 = vpop.eup %1566 }
 0x968   :  { %v745_v57 = vmul.f32 %v1567_v54, %v653_v41 }
 0x9cb   :  { %v748_v55 = vpop.permute.xlu0 %747 }
 0x9cc   :  { %v750_v56 = vmul.f32 %v1567_v54, %v748_v55  ;;  %v1069_v55 = vld [vmem:[#allocation2 + $0xe] sm:$0x3] }
 0x9ce   :  { %752 = vrot.lane.b32.xlu1 %v750_v56, %s1683_s30 }
 0xa40   :  { %v753_v58 = vpop.permute.xlu1 %752 }
 0xa41   :  { %v755_v59 = vadd.f32 %v753_v58, %v745_v57 }
 0xa43   :  { %1568 = vtanh.f32 %v755_v59 }
 0xa4d   :  { %v1569_v60 = vpop.eup %1568 }
 0xa4e   :  { %758 = vrot.lane.b32.xlu0 %v1569_v60, %s1682_s3 }
 0xac0   :  { %v759_v61 = vpop.permute.xlu0 %758 }
 0xac1   :  { %v761_v62 = vmul.f32 %v1567_v54, %v759_v61 }
 0xac3   :  { %765 = vrot.lane.b32.xlu1 %v761_v62, %s1683_s30 }
 0xb35   :  { %v766_v63 = vpop.permute.xlu1 %765 }
 0xb36   :  { %1421 = vmatmul.mubr.msk.f32.vlgmr.msra.gmra.mrb[4].mxu0 %vm357_vm2, %v766_v63 }
 0xb37   :  { %1511 = vmatpush3.bf16.msra.mxu0 %v1756_v7  ;;  %1442 = vmatprep.mubr.msk.f32.mxu0 %vm1679_vm0, %v1680_v1 }
 0xb38   :  { %1512 = vmatprep.subr.bf16.mxu0 %v1678_v0 }
 0xb3b   :  { %1514 = vmatpush3.bf16.msra.mxu0 %v1766_v11 }
 0xb3c   :  { %1521 = vmatprep.subr.bf16.mxu0 %v1678_v0 }
 0xc09   :  { %v835_v3 = vpop.f32.mrb[4].mxu0 }
 0xc0a   :  { %v839_v4 = vadd.f32 %v835_v3, %v763_v2  ;;  %v1422_v5 = vpop.f32.mrb[5].mxu0 }
 0xc0c   :  { %1570 = vtanh.f32 %v839_v4  ;;  %v1294_v8 = vmul.f32 -1.442695, %v839_v4 }
 0xc0e   :  { %1572 = vpow2.f32 %v1294_v8  ;;  %v1170_v8 = vld [vmem:[%s1893_s4] sm:$0xff] }
 0xc16   :  { %v1571_v6 = vpop.eup %1570 }
 0xc17   :  { %849 = vrot.lane.b32.xlu0 %v1571_v6, %s1682_s3 }
 0xc18   :  { %v1573_v9 = vpop.eup %1572 }
 0xc19   :  { %v843_v10 = vadd.f32 1.0, %v1573_v9  ;;  %v1171_v9 = vld [vmem:[%s1893_s4 + $0x8] sm:$0xff] }
 0xc1b   :  { %1574 = vrcp.f32 %v843_v10  ;;  %v1172_v10 = vld [vmem:[%s1893_s4 + $0x10] sm:$0xff] }
 0xc25   :  { %v1575_v12 = vpop.eup %1574 }
 0xc26   :  { %v847_v15 = vmul.f32 %v1575_v12, %v755_v59 }
 0xc89   :  { %v850_v13 = vpop.permute.xlu0 %849 }
 0xc8a   :  { %v852_v14 = vmul.f32 %v1575_v12, %v850_v13  ;;  %v1173_v13 = vld [vmem:[%s1893_s4 + $0x18] sm:$0xff]  ;;  %s1684_s4 = smov [#allocation8]  }
 0xc8b   :  { %s1264_s17 = sshll.u32 %s1684_s4, 4  ;;  %s1265_s17 = int_to_ptr.vmem [resolvable:$true] %s1264_s17 }
 0xc8c   :  { %854 = vrot.lane.b32.xlu1 %v852_v14, %s1683_s30  ;;  %v1525_v14 = vpack.c.bf16 %v1173_v13, %v1172_v10  ;;  %s1646_s18 = scalar_lea.vmem %s1265_s17, 32  ;;  %p1651_p3 = scmp.lt.s32.totalorder %s1265_s17, %s1265_s17 }
 0xc8d   :  { %p1647_p2 = scmp.ne.s32.totalorder %s1265_s17, %s1646_s18  ;;  %p1652_p4 = scmp.lt.s32.totalorder %s1646_s18, %s1646_s18 }
 0xc8f   :  { %p1653_p5 = por %p1652_p4, %p1651_p3 }
 0xc91   :  { %p1654_p6 = pnand %p1653_p5, %p1647_p2 }
 0xcfe   :  { %v855_v16 = vpop.permute.xlu1 %854 }
 0xcff   :  { %v857_v17 = vadd.f32 %v855_v16, %v847_v15 }
 0xd01   :  { %1576 = vtanh.f32 %v857_v17 }
 0xd0b   :  { %v1577_v18 = vpop.eup %1576 }
 0xd0c   :  { %860 = vrot.lane.b32.xlu0 %v1577_v18, %s1682_s3 }
 0xd7e   :  { %v861_v19 = vpop.permute.xlu0 %860 }
 0xd7f   :  { %v863_v20 = vmul.f32 %v1575_v12, %v861_v19  ;;  %v1522_v12 = vpack.c.bf16 %v1171_v9, %v1170_v8  ;;  %v1301_v19 = vld [vmem:[%s1894_s5] ss:$0 sm:$0xff] }
 0xd81   :  { %867 = vrot.lane.b32.xlu1 %v863_v20, %s1683_s30 }
 0xdf3   :  { %v868_v21 = vpop.permute.xlu1 %867 }
 0xdf4   :  { %1432 = vmatmul.mubr.msk.f32.vlgmr.msra.gmra.mrb[8].mxu1 %vm357_vm2, %v868_v21 }
 0xdf5   :  { %1517 = vmatpush3.bf16.msra.mxu1 %v1756_v7  ;;  %1453 = vmatprep.mubr.msk.f32.mxu1 %vm1679_vm0, %v1680_v1 }
 0xdf6   :  { %1518 = vmatprep.subr.bf16.mxu1 %v1678_v0 }
 0xdf9   :  { %1520 = vmatpush3.bf16.msra.mxu1 %v1766_v11 }
 0xec7   :  { %v937_v23 = vpop.f32.mrb[8].mxu1 }
 0xec8   :  { %v941_v24 = vadd.f32 %v937_v23, %v865_v22  ;;  %v1433_v25 = vpop.f32.mrb[9].mxu1 }
 0xeca   :  { %1578 = vtanh.f32 %v941_v24  ;;  %v1296_v27 = vmul.f32 -1.442695, %v941_v24 }
 0xecc   :  { %1580 = vpow2.f32 %v1296_v27 }
 0xed4   :  { %v1579_v26 = vpop.eup %1578 }
 0xed5   :  { %951 = vrot.lane.b32.xlu0 %v1579_v26, %s1682_s3 }
 0xed6   :  { %v1581_v28 = vpop.eup %1580 }
 0xed7   :  { %v945_v29 = vadd.f32 1.0, %v1581_v28 }
 0xed9   :  { %1582 = vrcp.f32 %v945_v29 }
 0xee3   :  { %v1583_v7 = vpop.eup %1582 }
 0xee4   :  { %v949_v32 = vmul.f32 %v1583_v7, %v857_v17 }
 0xf47   :  { %v952_v30 = vpop.permute.xlu0 %951 }
 0xf48   :  { %v954_v31 = vmul.f32 %v1583_v7, %v952_v30 }
 0xf4a   :  { %956 = vrot.lane.b32.xlu1 %v954_v31, %s1683_s30 }
 0xfbc   :  { %v957_v11 = vpop.permute.xlu1 %956 }
 0xfbd   :  { %v959_v33 = vadd.f32 %v957_v11, %v949_v32 }
 0xfbf   :  { %1584 = vtanh.f32 %v959_v33 }
 0xfc9   :  { %v1585_v34 = vpop.eup %1584 }
 0xfca   :  { %962 = vrot.lane.b32.xlu0 %v1585_v34, %s1682_s3 }
0x103c   :  { %v963_v35 = vpop.permute.xlu0 %962 }
0x103d   :  { %v965_v36 = vmul.f32 %v1583_v7, %v963_v35 }
0x103f   :  { %969 = vrot.lane.b32.xlu1 %v965_v36, %s1683_s30 }
0x10b1   :  { %v970_v37 = vpop.permute.xlu1 %969 }
0x10b2   :  { %1443 = vmatmul.mubr.msk.f32.vlgmr.msra.gmra.mrb[6].mxu0 %vm357_vm2, %v970_v37 }
0x10b3   :  { %1464 = vmatprep.mubr.msk.f32.mxu0 %vm1679_vm0, %v1680_v1  ;;  %1523 = vmatpush3.bf16.msra.mxu0 %v1522_v12 }
0x10b4   :  { %1524 = vmatprep.subr.bf16.mxu0 %v1678_v0 }
0x10b7   :  { %1526 = vmatpush3.bf16.msra.mxu0 %v1525_v14 }
0x1185   :  { %v1039_v39 = vpop.f32.mrb[6].mxu0 }
0x1186   :  { %v1043_v40 = vadd.f32 %v1039_v39, %v967_v38  ;;  %v1444_v41 = vpop.f32.mrb[7].mxu0 }
0x1188   :  { %1586 = vtanh.f32 %v1043_v40  ;;  %v1298_v43 = vmul.f32 -1.442695, %v1043_v40 }
0x118a   :  { %1588 = vpow2.f32 %v1298_v43 }
0x1192   :  { %v1587_v42 = vpop.eup %1586 }
0x1193   :  { %1053 = vrot.lane.b32.xlu0 %v1587_v42, %s1682_s3 }
0x1194   :  { %v1589_v44 = vpop.eup %1588 }
0x1195   :  { %v1047_v45 = vadd.f32 1.0, %v1589_v44 }
0x1197   :  { %1590 = vrcp.f32 %v1047_v45 }
0x11a1   :  { %v1591_v46 = vpop.eup %1590 }
0x11a2   :  { %v1051_v49 = vmul.f32 %v1591_v46, %v959_v33 }
0x1205   :  { %v1054_v47 = vpop.permute.xlu0 %1053 }
0x1206   :  { %v1056_v48 = vmul.f32 %v1591_v46, %v1054_v47 }
0x1208   :  { %1058 = vrot.lane.b32.xlu1 %v1056_v48, %s1683_s30 }
0x127a   :  { %v1059_v1 = vpop.permute.xlu1 %1058 }
0x127b   :  { %v1061_v50 = vadd.f32 %v1059_v1, %v1051_v49 }
0x127d   :  { %1592 = vtanh.f32 %v1061_v50 }
0x1287   :  { %v1593_v51 = vpop.eup %1592 }
0x1288   :  { %1064 = vrot.lane.b32.xlu0 %v1593_v51, %s1682_s3 }
0x12fa   :  { %v1065_v52 = vpop.permute.xlu0 %1064 }
0x12fb   :  { %v1067_v53 = vmul.f32 %v1591_v46, %v1065_v52 }
0x12fd   :  { %1071 = vrot.lane.b32.xlu1 %v1067_v53, %s1683_s30 }
0x136f   :  { %v1072_v54 = vpop.permute.xlu1 %1071 }
0x1370   :  { %1454 = vmatmul.mubr.msk.f32.vlgmr.msra.gmra.mrb[10].mxu1 %vm357_vm2, %v1072_v54 }
0x1443   :  { %v1141_v56 = vpop.f32.mrb[10].mxu1 }
0x1444   :  { %v1145_v57 = vadd.f32 %v1141_v56, %v1069_v55  ;;  %v1455_v58 = vpop.f32.mrb[11].mxu1 }
0x1446   :  { %1594 = vtanh.f32 %v1145_v57  ;;  %v1300_v60 = vmul.f32 -1.442695, %v1145_v57 }
0x1448   :  { %1596 = vpow2.f32 %v1300_v60 }
0x1450   :  { %v1595_v59 = vpop.eup %1594 }
0x1451   :  { %1155 = vrot.lane.b32.xlu0 %v1595_v59, %s1682_s3 }
0x1452   :  { %v1597_v61 = vpop.eup %1596 }
0x1453   :  { %v1149_v62 = vadd.f32 1.0, %v1597_v61 }
0x1455   :  { %1598 = vrcp.f32 %v1149_v62 }
0x145f   :  { %v1599_v63 = vpop.eup %1598 }
0x1460   :  { %v1153_v4 = vmul.f32 %v1599_v63, %v1061_v50 }
0x14c3   :  { %v1156_v2 = vpop.permute.xlu0 %1155 }
0x14c4   :  { %v1158_v3 = vmul.f32 %v1599_v63, %v1156_v2 }
0x14c6   :  { %1160 = vrot.lane.b32.xlu1 %v1158_v3, %s1683_s30 }
0x1538   :  { %v1161_v5 = vpop.permute.xlu1 %1160 }
0x1539   :  { %v1163_v6 = vadd.f32 %v1161_v5, %v1153_v4 }
0x153b   :  { %1600 = vtanh.f32 %v1163_v6 }
0x1545   :  { %v1601_v15 = vpop.eup %1600 }
0x1546   :  { %1166 = vrot.lane.b32.xlu0 %v1601_v15, %s1682_s3 }
0x15b8   :  { %v1167_v16 = vpop.permute.xlu0 %1166 }
0x15b9   :  { %v1169_v17 = vmul.f32 %v1599_v63, %v1167_v16 }
0x15bb   :  { %1182 = vrot.lane.b32.xlu1 %v1169_v17, %s1683_s30 }
0x162d   :  { %v1183_v18 = vpop.permute.xlu1 %1182 }
0x162e   :  { %1465 = vmatmul.mubr.msk.f32.vlgmr.msra.gmra.mrb[8].mxu0 %vm357_vm2, %v1183_v18 }
0x1701   :  { %v1252_v20 = vpop.f32.mrb[8].mxu0 }
0x1702   :  { %v1253_v0 = vadd.f32 %v1301_v19, %v1252_v20  ;;  %v1466_v21 = vpop.f32.mrb[9].mxu0 }
0x1704   :  { %1257 = vst.msk [vmem:[#allocation8] sm:$0x3] %vm1256_vm3, %v1253_v0 }
0x1705   :  { %1657 = shalt.err (!%p1654_p6)
}
0x1706   :  { %s1658_s0 = scalar_lea.hbm %s1895_s6, 32 }
0x1707   :  { %p1659_p7 = scmp.ne.s32.totalorder %s1895_s6, %s1658_s0  ;;  %p1662_p8 = scmp.lt.u32.totalorder %s1658_s0, %s1895_s6 }
0x1709   :  { %p1664_p9 = pnand %p1662_p8, %p1659_p7 }
0x170b   :  { %1667 = shalt.err (!%p1664_p9)
}
0x170c   :  { %1267 = dma.vmem_to_hbm [thread:$0]  %s1265_s17, 32, %s1895_s6, [#allocation5]  }
0x170d   :  { %1672 = dma.done.wait [#allocation5], 32  }
0x170e   :  { %1673 = vsyncadd [#allocation5], 4294967264 }
0x170f   :  { %1271 = vsyncpa [#allocation4], 1 }
0x1710   :  { %1272 = vsyncpa [#allocation7], 1 }
0x1711   :  { %1273 = vsyncpa [#allocation5], 1 }

</bundles_post_ra>
